<compile_context>
chip_gen: v5e
topology: v5e:2x2
jax: 0.10.0
libtpu: 0.0.40
codegen_flags: <defaults>
</compile_context>

<pallas_src>
import functools

import jax
import jax.numpy as jnp
from jax.experimental import pallas as pl
from jax.experimental.pallas import tpu as pltpu

LANE = 128          # vreg lane width (last dim)
SUBLANE_F32 = 8     # vreg sublane width for 32-bit dtypes

# Kernel-buffer budget and scoped-VMEM limit, safe across v5e / v6e / v7x:
#   v7x has only 64 MiB physical VMEM per TC, v5e defaults to a 16 MiB scope.
_VMEM_BUDGET = 28 * 1024 * 1024
_VMEM_LIMIT = 40 * 1024 * 1024


def _round_up(n, m):
    return ((n + m - 1) // m) * m


def _cdiv(a, b):
    return -(-a // b)


def _linear_kernel(x_ref, wt_ref, b_ref, o_ref):
    """Single K block: y = x @ W_T + b, one MXU pass, f32 accumulation."""
    acc = jnp.dot(x_ref[...], wt_ref[...], preferred_element_type=jnp.float32)
    o_ref[...] = (acc + b_ref[...]).astype(o_ref.dtype)


def _linear_kernel_ktiled(x_ref, wt_ref, b_ref, o_ref, acc_ref):
    """K-tiled: accumulate partial products over the feature dim in f32 VMEM."""
    k = pl.program_id(1)

    @pl.when(k == 0)
    def _():
        acc_ref[...] = jnp.zeros_like(acc_ref)

    acc_ref[...] += jnp.dot(x_ref[...], wt_ref[...],
                            preferred_element_type=jnp.float32)

    @pl.when(k == pl.num_programs(1) - 1)
    def _():
        o_ref[...] = (acc_ref[...] + b_ref[...]).astype(o_ref.dtype)


@functools.partial(jax.jit, static_argnames=("block_b", "block_d", "stream_dtype"))
def linear_svm(x, weight, bias, *, block_b=2048, block_d=None, stream_dtype=None):
    """LinearSVM forward: x @ weight.T + bias (PyTorch nn.Linear convention).

    Args:
      x:      (B, D) float32 inputs.
      weight: (C, D) float32 nn.Linear weight.
      bias:   (C,)   float32 nn.Linear bias.
      block_b: requested batch tile (rounded to the sublane multiple and capped
               by the VMEM budget; the actual tile is balanced over the grid).
      block_d: optional feature-dim tile; forces the K-tiled accumulator path.
      stream_dtype: optional reduced-precision dtype (e.g. jnp.bfloat16) used
               to stream x / W; accumulation and bias add stay in f32.
    Returns:
      (B, C) scores in x's original dtype.
    """
    assert x.ndim == 2 and weight.ndim == 2 and bias.ndim == 1
    B, D = x.shape
    C = weight.shape[0]
    assert weight.shape[1] == D and bias.shape[0] == C
    out_dtype = x.dtype

    # ---- optional reduced-precision streaming of the HBM-dominant operands ---
    if stream_dtype is not None:
        x = x.astype(stream_dtype)
        weight = weight.astype(stream_dtype)
    xsz = jnp.dtype(x.dtype).itemsize
    wsz = jnp.dtype(weight.dtype).itemsize
    sub = max(SUBLANE_F32, 32 // xsz)        # 8 for f32, 16 for bf16

    # ---- output lane padding only when the x read stream dominates (D large) -
    Cp = _round_up(C, LANE) if D >= 512 else C
    wt = weight.T                            # one-time XLA transpose of the small weight
    if Cp != C:
        wt = jnp.pad(wt, ((0, 0), (0, Cp - C)))
        bias = jnp.pad(bias, (0, Cp - C))
    bias2 = bias.astype(jnp.float32).reshape(1, Cp)

    # ---- decide between the single-K-block path and the K-tiled path ---------
    resident_full = D * Cp * wsz + Cp * 4              # W (1 buffer) + bias
    per_row_full = 2 * D * xsz + 2 * Cp * 4            # x + out, double-buffered
    tb_cap_simple = (_VMEM_BUDGET - resident_full) // per_row_full
    use_ktiled = (block_d is not None) or (
        tb_cap_simple < min(512, _round_up(B, sub)))

    if use_ktiled:
        TK = _round_up(block_d if block_d is not None else 512, LANE)
        TK = min(TK, _round_up(D, LANE))
        Dp = _round_up(D, TK)
        if Dp != D:
            x = jnp.pad(x, ((0, 0), (0, Dp - D)))
            wt = jnp.pad(wt, ((0, Dp - D), (0, 0)))
        resident = 2 * TK * Cp * wsz + Cp * 4           # W double-buffered over K
        per_row = 2 * TK * xsz + 3 * Cp * 4             # x + out dbl-buf + f32 acc
    else:
        TK, Dp = D, D
        resident = resident_full
        per_row = per_row_full

    # ---- batch tile: VMEM-capped, sublane-rounded, balanced over the grid ----
    tb_cap = max(sub, (_VMEM_BUDGET - resident) // per_row // sub * sub)
    block_b_eff = max(sub, min(block_b // sub * sub, tb_cap))
    n_tiles = _cdiv(B, block_b_eff)
    if n_tiles == 1 and B >= 256:
        n_tiles = 2                                     # give v7x's 2 TCs work to split
    TB = min(_round_up(_cdiv(B, n_tiles), sub), block_b_eff)
    n_tiles = _cdiv(B, TB)
    Bp = n_tiles * TB
    if Bp != B:
        x = jnp.pad(x, ((0, Bp - B), (0, 0)))

    cparams = pltpu.CompilerParams(
        dimension_semantics=("parallel", "arbitrary") if use_ktiled else ("parallel",),
        vmem_limit_bytes=_VMEM_LIMIT,
    )

    if use_ktiled:
        out = pl.pallas_call(
            _linear_kernel_ktiled,
            out_shape=jax.ShapeDtypeStruct((Bp, Cp), out_dtype),
            grid_spec=pltpu.PrefetchScalarGridSpec(
                num_scalar_prefetch=0,
                grid=(n_tiles, Dp // TK),
                in_specs=[
                    pl.BlockSpec((TB, TK), lambda i, k: (i, k)),   # x: stream B and K
                    pl.BlockSpec((TK, Cp), lambda i, k: (k, 0)),   # W.T: stream K
                    pl.BlockSpec((1, Cp), lambda i, k: (0, 0),     # bias: resident,
                                 pipeline_mode=pl.Buffered(1)),    #   single buffer
                ],
                out_specs=pl.BlockSpec((TB, Cp), lambda i, k: (i, 0)),
                scratch_shapes=[pltpu.VMEM((TB, Cp), jnp.float32)],
            ),
            compiler_params=cparams,
        )(x, wt, bias2)
    else:
        out = pl.pallas_call(
            _linear_kernel,
            out_shape=jax.ShapeDtypeStruct((Bp, Cp), out_dtype),
            grid_spec=pltpu.PrefetchScalarGridSpec(
                num_scalar_prefetch=0,
                grid=(n_tiles,),
                in_specs=[
                    pl.BlockSpec((TB, D), lambda i: (i, 0)),       # x: stream over batch
                    pl.BlockSpec((D, Cp), lambda i: (0, 0),        # W.T: resident,
                                 pipeline_mode=pl.Buffered(1)),    #   single buffer
                    pl.BlockSpec((1, Cp), lambda i: (0, 0),        # bias: resident
                                 pipeline_mode=pl.Buffered(1)),
                ],
                out_specs=pl.BlockSpec((TB, Cp), lambda i: (i, 0)),
            ),
            compiler_params=cparams,
        )(x, wt, bias2)

    # Drop batch padding and (if any) class-lane padding.
    return out[:B, :C]


if __name__ == "__main__":
    key = jax.random.PRNGKey(0)
    kx, kw, kb = jax.random.split(key, 3)

    # Small shapes consistent with the module: tabular features -> 2 classes.
    batch, input_size, num_classes = 8, 32, 2

    x = jax.random.normal(kx, (batch, input_size), dtype=jnp.float32)
    # nn.Linear default init: U(-1/sqrt(in_features), 1/sqrt(in_features)).
    bound = 1.0 / jnp.sqrt(jnp.float32(input_size))
    weight = jax.random.uniform(kw, (num_classes, input_size), jnp.float32,
                                minval=-bound, maxval=bound)
    bias = jax.random.uniform(kb, (num_classes,), jnp.float32,
                              minval=-bound, maxval=bound)

    # 1) Default f32 path (single K block, unpadded small-C output).
    out = jax.block_until_ready(linear_svm(x, weight, bias))
    ref = x @ weight.T + bias
    assert out.shape == (batch, num_classes)
    assert jnp.allclose(out, ref, atol=1e-5, rtol=1e-5)

    # 2) bf16 streaming path (halves the dominant HBM read stream; f32 accum).
    out_bf16 = jax.block_until_ready(
        linear_svm(x, weight, bias, stream_dtype=jnp.bfloat16))
    assert out_bf16.shape == (batch, num_classes)
    assert jnp.allclose(out_bf16, ref, atol=5e-2, rtol=5e-2)

    # 3) K-tiled accumulator path, forced at a small feature dim (D=256, TK=128).
    batch2, d2 = 24, 256
    x2 = jax.random.normal(kx, (batch2, d2), dtype=jnp.float32)
    bound2 = 1.0 / jnp.sqrt(jnp.float32(d2))
    w2 = jax.random.uniform(kw, (num_classes, d2), jnp.float32,
                            minval=-bound2, maxval=bound2)
    b2 = jax.random.uniform(kb, (num_classes,), jnp.float32,
                            minval=-bound2, maxval=bound2)
    out2 = jax.block_until_ready(linear_svm(x2, w2, b2, block_d=128))
    ref2 = x2 @ w2.T + b2
    assert out2.shape == (batch2, num_classes)
    assert jnp.allclose(out2, ref2, atol=1e-4, rtol=1e-4)

    print("KERNEL_OK")
</pallas_src>

<mosaic_0001>
module attributes {stable_mosaic.version = 11 : i64} {
  func.func @_linear_kernel(%arg0: i32, %arg1: memref<8x32xf32, #tpu.memory_space<vmem>>, %arg2: memref<32x2xf32, #tpu.memory_space<vmem>>, %arg3: memref<1x2xf32, #tpu.memory_space<vmem>>, %arg4: memref<8x2xf32, #tpu.memory_space<vmem>>) attributes {dimension_semantics = [#tpu.dimension_semantics<parallel>], iteration_bounds = array<i64: 1>, scalar_prefetch = 0 : i64, scratch_operands = 0 : i64, tpu.core_type = #tpu.core_type<tc>, window_params = [{transform_indices = @transform_0, window_bounds = array<i64: 8, 32>}, {pipeline_mode = #tpu.pipeline_mode<synchronous>, transform_indices = @transform_1, window_bounds = array<i64: 32, 2>}, {pipeline_mode = #tpu.pipeline_mode<synchronous>, transform_indices = @transform_2, window_bounds = array<i64: 1, 2>}, {transform_indices = @transform_3, window_bounds = array<i64: 8, 2>}]} {
    %c0 = arith.constant 0 : index
    %c0_0 = arith.constant 0 : index
    %0 = vector.load %arg1[%c0, %c0_0] : memref<8x32xf32, #tpu.memory_space<vmem>>, vector<8x32xf32>
    %c0_1 = arith.constant 0 : index
    %c0_2 = arith.constant 0 : index
    %1 = vector.load %arg2[%c0_1, %c0_2] : memref<32x2xf32, #tpu.memory_space<vmem>>, vector<32x2xf32>
    %cst = arith.constant dense<0.000000e+00> : vector<8x2xf32>
    %2 = tpu.matmul %0, %1, %cst {dimension_numbers = #tpu.dot_dimension_numbers<[1], [0], [0], [1], [0, 0, 1, 1], [], []>} : vector<8x32xf32>, vector<32x2xf32>, vector<8x2xf32> -> vector<8x2xf32>
    %c0_3 = arith.constant 0 : index
    %c0_4 = arith.constant 0 : index
    %3 = vector.load %arg3[%c0_3, %c0_4] : memref<1x2xf32, #tpu.memory_space<vmem>>, vector<1x2xf32>
    %4 = vector.broadcast %3 : vector<1x2xf32> to vector<8x2xf32>
    %5 = arith.addf %2, %4 : vector<8x2xf32>
    %c0_5 = arith.constant 0 : index
    %c0_6 = arith.constant 0 : index
    %6 = vector.load %arg4[%c0_5, %c0_6] : memref<8x2xf32, #tpu.memory_space<vmem>>, vector<8x2xf32>
    tpu.vector_store %arg4[%c0_5, %c0_6], %5 {strides = array<i32>} : memref<8x2xf32, #tpu.memory_space<vmem>>, vector<8x2xf32>,
    return
  }
  func.func @transform_0(%arg0: i32) -> (i32, i32) {
    %c0_i32 = arith.constant 0 : i32
    %c0_i32_0 = arith.constant 0 : i32
    return %arg0, %c0_i32 : i32, i32
  }
  func.func @transform_1(%arg0: i32) -> (i32, i32) {
    %c0_i32 = arith.constant 0 : i32
    %c0_i32_0 = arith.constant 0 : i32
    %c0_i32_1 = arith.constant 0 : i32
    return %c0_i32, %c0_i32_0 : i32, i32
  }
  func.func @transform_2(%arg0: i32) -> (i32, i32) {
    %c0_i32 = arith.constant 0 : i32
    %c0_i32_0 = arith.constant 0 : i32
    %c0_i32_1 = arith.constant 0 : i32
    return %c0_i32, %c0_i32_0 : i32, i32
  }
  func.func @transform_3(%arg0: i32) -> (i32, i32) {
    %c0_i32 = arith.constant 0 : i32
    %c0_i32_0 = arith.constant 0 : i32
    return %arg0, %c0_i32 : i32, i32
  }
}

</mosaic_0001>

<bundles_post_ra>
// kernel: linear_svm.1
= control target key start
LH: loop header
LB: loop body
LE: loop exit
PB: predicated region body
PF: predicated region fallthrough
CT: control target
= control target key end

     0   :  { %vm23_vm0 = vcmask 261120   ;;  %vm47_vm1 = vcmask 15360   ;;  %s96_s1 = inlined_call_operand.vmem [shape: f32[32,2], index: 1, kind: input, shape index: {}]   ;;  %s97_s2 = inlined_call_operand.vmem [shape: f32[1,2], index: 2, kind: input, shape index: {}]   ;;  %s98_s0 = inlined_call_operand.vmem [shape: f32[8,32], index: 0, kind: input, shape index: {}]   ;;  %s99_s3 = inlined_call_operand.vmem [shape: f32[8,2], index: 3, kind: output, shape index: {}]  }
   0x1   :  { %v18_v0 = vld [vmem:[%s96_s1 + $0x18] sm:$0xff]  ;;  %v17_v1 = vld [vmem:[%s96_s1 + $0x10] sm:$0xff]  ;;  %v16_v2 = vld [vmem:[%s96_s1 + $0x8] sm:$0xff] }
   0x2   :  { %39 = vmatpush.msra.mxu0 %v18_v0  ;;  %v15_v3 = vld [vmem:[%s96_s1] sm:$0xff] }
   0x3   :  { %v14_v4 = vld [vmem:[%s98_s0] sm:$0xff] }
   0x4   :  { %40 = vmatpush.msra.mxu0 %v17_v1  ;;  %v54_v5 = vld [vmem:[%s97_s2] ss:$0 sm:$0xff] }
   0x6   :  { %41 = vmatpush.msra.mxu0 %v16_v2 }
   0x8   :  { %42 = vmatpush.msra.mxu0 %v15_v3 }
   0x9   :  { %53 = vmatmul.msk.f32.vlgmr.msra.gmra.mxu0 %vm23_vm0, %v14_v4 }
  0x86   :  { %v44_v6 = vpop.f32.mrf.mxu0 }
  0x87   :  { %v45_v7 = vadd.f32 %v54_v5, %v44_v6 }
  0x89   :  { %48 = vst.msk [vmem:[%s99_s3] sm:$0xff] %vm47_vm1, %v45_v7 }

</bundles_post_ra>
